<compile_context>
chip_gen: v6e
topology: v6e:2x2x1
jax: 0.10.0
libtpu: 0.0.40
codegen_flags: <defaults>
</compile_context>

<pallas_src>
import math
import jax
import jax.numpy as jnp
from jax.experimental import pallas as pl
from jax.experimental.pallas import tpu as pltpu

# ------------------------- config (small synthetic) -------------------------
NUM_LOCATIONS = 64
NUM_USERS = 16
NUM_PROTOS = 5          # num_locaiton_prototypes in the module
PROTO_PAD = 8           # prototype rows padded to a sublane multiple
BASE_DIM = 32
NUM_TIMESLOTS = 168

# packed parameter slab layout (all offsets are multiples of 8 sublanes)
WL_STACK_ROWS = 40      # rows 0:32 = Wl.T, row 32 = bl, rows 33:40 = 0
WP_OFF = 40             # rows 40:72 = Wp.T
BP_OFF = 72             # rows 72:80 = bp replicated on every row
PROTO_OFF = 80          # rows 80:88 = prototype table (rows >= NUM_PROTOS are 0)
SLAB_ROWS = 88


def _loc_proto_kernel(loc_ref, slab_ref, out_ref):
    # loc_ref:  (L, D)          full location_embedding table
    # slab_ref: (SLAB_ROWS, D)  packed parameters (see layout above)
    # out_ref:  (L, D)          loc_proto_repr
    d = loc_ref.shape[-1]
    inv_sqrt_d = jnp.float32(1.0 / math.sqrt(d))

    # static, sublane-aligned slices of the single packed parameter slab
    wl_stack = slab_ref[0:WL_STACK_ROWS, :]        # (40, D) [Wl.T ; bl ; 0]
    wp_t     = slab_ref[WP_OFF:BP_OFF, :]          # (D, D)  Wp.T
    bp_blk   = slab_ref[BP_OFF:PROTO_OFF, :]       # (8, D)  bp replicated
    proto    = slab_ref[PROTO_OFF:SLAB_ROWS, :]    # (8, D)  prototypes (padded)

    # prototype projection: proto @ Wp.T + bp   (padded rows -> bp, masked later)
    proto_emb = jnp.dot(proto, wp_t,
                        preferred_element_type=jnp.float32) + bp_blk

    # merged [Wl.T ; bl] contraction against proto_emb (single MXU push):
    #   (loc @ Wl.T + bl) @ proto_emb.T
    #     == loc @ (Wl.T contr proto_emb) + (bl contr proto_emb)
    contract_last = (((1,), (1,)), ((), ()))
    mc = jax.lax.dot_general(wl_stack, proto_emb, contract_last,
                             preferred_element_type=jnp.float32)  # (40, P_pad)
    m_mat = mc[0:d, :]            # (D, P_pad)
    c_row = mc[d:d + 1, :]        # (1, P_pad)

    scores = (jnp.dot(loc_ref[...], m_mat,
                      preferred_element_type=jnp.float32) + c_row) * inv_sqrt_d

    # mask padded prototype columns before softmax
    col = jax.lax.broadcasted_iota(jnp.int32, scores.shape, 1)
    scores = jnp.where(col < NUM_PROTOS, scores, jnp.float32(-1e30))

    m = jnp.max(scores, axis=-1, keepdims=True)
    e = jnp.exp(scores - m)
    # exact divide: keeps output within f32 rounding of the reference
    w = e / jnp.sum(e, axis=-1, keepdims=True)

    # weights @ raw prototype embeddings (padded rows are zero -> inert)
    out_ref[...] = jnp.dot(w, proto, preferred_element_type=jnp.float32)


def loc_proto_repr_pallas(location_table, param_slab):
    L, D = location_table.shape
    return pl.pallas_call(
        _loc_proto_kernel,
        out_shape=jax.ShapeDtypeStruct((L, D), jnp.float32),
        grid_spec=pltpu.PrefetchScalarGridSpec(
            num_scalar_prefetch=0,
            grid=(1,),                                   # single step: pure overhead kernel
            in_specs=[
                pl.BlockSpec((L, D), lambda i: (0, 0)),           # location table
                pl.BlockSpec((SLAB_ROWS, D), lambda i: (0, 0)),   # packed params
            ],
            out_specs=pl.BlockSpec((L, D), lambda i: (0, 0)),
        ),
        # "arbitrary" -> never split this micro-kernel across TensorCores (v7x)
        compiler_params=pltpu.CompilerParams(
            dimension_semantics=("arbitrary",)),
    )(location_table, param_slab)


def my_embedding_forward(params, batch_data):
    # batch_data['location_x'] is only used for device placement in the
    # original module; the forward output does not depend on its values.
    location_all = params["location_embedding"]          # (L, D)
    timeslot_embedded = params["timeslot_embedding"]     # (168, D)
    user_embedded = params["user_embedding"]             # (U, D)

    loc_proto_repr = loc_proto_repr_pallas(location_all, params["param_slab"])
    return location_all, timeslot_embedded, user_embedded, loc_proto_repr


def _build_param_slab(loc_proj_w, loc_proj_b, proto_proj_w, proto_proj_b, proto):
    """Built ONCE at init: all small parameter operands in one DMA-able slab."""
    d = BASE_DIM
    slab = jnp.zeros((SLAB_ROWS, d), jnp.float32)
    slab = slab.at[0:d].set(loc_proj_w.T)                               # Wl.T
    slab = slab.at[d].set(loc_proj_b)                                   # bl
    slab = slab.at[WP_OFF:WP_OFF + d].set(proto_proj_w.T)               # Wp.T
    slab = slab.at[BP_OFF:PROTO_OFF].set(
        jnp.broadcast_to(proto_proj_b, (PROTO_OFF - BP_OFF, d)))        # bp x8
    slab = slab.at[PROTO_OFF:PROTO_OFF + NUM_PROTOS].set(proto)         # protos
    return slab


def init_params(key):
    ks = jax.random.split(key, 8)
    d = BASE_DIM
    bound = 1.0 / math.sqrt(d)
    proto = jax.random.normal(ks[2], (NUM_PROTOS, d), jnp.float32)
    loc_proj_w = jax.random.uniform(ks[4], (d, d), jnp.float32, -bound, bound)
    loc_proj_b = jax.random.uniform(ks[5], (d,), jnp.float32, -bound, bound)
    proto_proj_w = jax.random.uniform(ks[6], (d, d), jnp.float32, -bound, bound)
    proto_proj_b = jax.random.uniform(ks[7], (d,), jnp.float32, -bound, bound)
    return {
        # nn.Embedding default init ~ N(0, 1)
        "user_embedding": jax.random.normal(ks[0], (NUM_USERS, d), jnp.float32),
        "location_embedding": jax.random.normal(ks[1], (NUM_LOCATIONS, d), jnp.float32),
        "prototypes_embedding": proto,
        "timeslot_embedding": jax.random.normal(ks[3], (NUM_TIMESLOTS, d), jnp.float32),
        # nn.Linear default init ~ U(-1/sqrt(fan_in), 1/sqrt(fan_in))
        "loc_proj_w": loc_proj_w,
        "loc_proj_b": loc_proj_b,
        "proto_proj_w": proto_proj_w,
        "proto_proj_b": proto_proj_b,
        # packed, pre-transposed parameter slab (built once, not per forward)
        "param_slab": _build_param_slab(loc_proj_w, loc_proj_b,
                                        proto_proj_w, proto_proj_b, proto),
    }


def reference_forward(params):
    loc = params["location_embedding"]
    proto = params["prototypes_embedding"]
    loc_emb = loc @ params["loc_proj_w"].T + params["loc_proj_b"]
    proto_emb = proto @ params["proto_proj_w"].T + params["proto_proj_b"]
    scores = (loc_emb @ proto_emb.T) / (BASE_DIM ** 0.5)
    w = jax.nn.softmax(scores, axis=-1)
    return w @ proto


if __name__ == "__main__":
    key = jax.random.PRNGKey(0)
    pkey, xkey = jax.random.split(key)
    params = init_params(pkey)

    # dummy batch: location indices, shape (batch=2, seq=8); values unused by
    # the forward math (matches the PyTorch module, which only uses .device).
    batch_data = {
        "location_x": jax.random.randint(xkey, (2, 8), 0, NUM_LOCATIONS, jnp.int32)
    }

    outs = my_embedding_forward(params, batch_data)
    outs = jax.block_until_ready(outs)
    location_all, timeslot_embedded, user_embedded, loc_proto_repr = outs

    assert location_all.shape == (NUM_LOCATIONS, BASE_DIM)
    assert timeslot_embedded.shape == (NUM_TIMESLOTS, BASE_DIM)
    assert user_embedded.shape == (NUM_USERS, BASE_DIM)
    assert loc_proto_repr.shape == (NUM_LOCATIONS, BASE_DIM)

    ref = reference_forward(params)
    max_err = float(jnp.max(jnp.abs(loc_proto_repr - ref)))
    assert max_err < 1e-3, f"mismatch vs reference: {max_err}"

    print("KERNEL_OK")
</pallas_src>

<mosaic_0001>
module attributes {stable_mosaic.version = 11 : i64} {
  func.func @_loc_proto_kernel(%arg0: i32, %arg1: memref<64x32xf32, #tpu.memory_space<vmem>>, %arg2: memref<88x32xf32, #tpu.memory_space<vmem>>, %arg3: memref<64x32xf32, #tpu.memory_space<vmem>>) attributes {dimension_semantics = [#tpu.dimension_semantics<arbitrary>], iteration_bounds = array<i64: 1>, scalar_prefetch = 0 : i64, scratch_operands = 0 : i64, tpu.core_type = #tpu.core_type<tc>, window_params = [{pipeline_mode = #tpu.pipeline_mode<synchronous>, transform_indices = @transform_0, window_bounds = array<i64: 64, 32>}, {pipeline_mode = #tpu.pipeline_mode<synchronous>, transform_indices = @transform_1, window_bounds = array<i64: 88, 32>}, {pipeline_mode = #tpu.pipeline_mode<synchronous>, transform_indices = @transform_2, window_bounds = array<i64: 64, 32>}]} {
    %c0 = arith.constant 0 : index
    %c0_0 = arith.constant 0 : index
    %0 = vector.load %arg2[%c0, %c0_0] : memref<88x32xf32, #tpu.memory_space<vmem>>, vector<40x32xf32>
    %c40 = arith.constant 40 : index
    %c0_1 = arith.constant 0 : index
    %1 = vector.load %arg2[%c40, %c0_1] : memref<88x32xf32, #tpu.memory_space<vmem>>, vector<32x32xf32>
    %c72 = arith.constant 72 : index
    %c0_2 = arith.constant 0 : index
    %2 = vector.load %arg2[%c72, %c0_2] : memref<88x32xf32, #tpu.memory_space<vmem>>, vector<8x32xf32>
    %c80 = arith.constant 80 : index
    %c0_3 = arith.constant 0 : index
    %3 = vector.load %arg2[%c80, %c0_3] : memref<88x32xf32, #tpu.memory_space<vmem>>, vector<8x32xf32>
    %cst = arith.constant dense<0.000000e+00> : vector<8x32xf32>
    %4 = tpu.matmul %3, %1, %cst {dimension_numbers = #tpu.dot_dimension_numbers<[1], [0], [0], [1], [0, 0, 1, 1], [], []>} : vector<8x32xf32>, vector<32x32xf32>, vector<8x32xf32> -> vector<8x32xf32>
    %5 = arith.addf %4, %2 : vector<8x32xf32>
    %cst_4 = arith.constant dense<0.000000e+00> : vector<40x8xf32>
    %6 = tpu.matmul %0, %5, %cst_4 {dimension_numbers = #tpu.dot_dimension_numbers<[1], [1], [0], [0], [0, 0, 1, 0], [], []>} : vector<40x32xf32>, vector<8x32xf32>, vector<40x8xf32> -> vector<40x8xf32>
    %7 = vector.extract_strided_slice %6 {offsets = [0, 0], sizes = [32, 8], strides = [1, 1]} : vector<40x8xf32> to vector<32x8xf32>
    %8 = vector.extract_strided_slice %6 {offsets = [32, 0], sizes = [1, 8], strides = [1, 1]} : vector<40x8xf32> to vector<1x8xf32>
    %c0_5 = arith.constant 0 : index
    %c0_6 = arith.constant 0 : index
    %9 = vector.load %arg1[%c0_5, %c0_6] : memref<64x32xf32, #tpu.memory_space<vmem>>, vector<64x32xf32>
    %cst_7 = arith.constant dense<0.000000e+00> : vector<64x8xf32>
    %10 = tpu.matmul %9, %7, %cst_7 {dimension_numbers = #tpu.dot_dimension_numbers<[1], [0], [0], [1], [0, 0, 1, 1], [], []>} : vector<64x32xf32>, vector<32x8xf32>, vector<64x8xf32> -> vector<64x8xf32>
    %11 = vector.broadcast %8 : vector<1x8xf32> to vector<64x8xf32>
    %12 = arith.addf %10, %11 : vector<64x8xf32>
    %cst_8 = arith.constant 0.176776692 : f32
    %13 = vector.broadcast %cst_8 : f32 to vector<64x8xf32>
    %14 = arith.mulf %12, %13 : vector<64x8xf32>
    %15 = tpu.iota {dimensions = array<i32: 1>} : vector<64x8xi32>
    %c5_i32 = arith.constant 5 : i32
    %16 = vector.broadcast %c5_i32 : i32 to vector<64x8xi32>
    %17 = arith.cmpi slt, %15, %16 : vector<64x8xi32>
    %cst_9 = arith.constant -1.000000e+30 : f32
    %18 = vector.broadcast %cst_9 : f32 to vector<64x8xf32>
    %19 = arith.select %17, %14, %18 : vector<64x8xi1>, vector<64x8xf32>
    %cst_10 = arith.constant dense<0xFF800000> : vector<64xf32>
    %20 = vector.multi_reduction <maximumf>, %19, %cst_10 [1] : vector<64x8xf32> to vector<64xf32>
    %21 = vector.shape_cast %20 : vector<64xf32> to vector<64x1xf32>
    %22 = vector.broadcast %21 : vector<64x1xf32> to vector<64x8xf32>
    %23 = arith.subf %19, %22 : vector<64x8xf32>
    %24 = math.exp %23 : vector<64x8xf32>
    %cst_11 = arith.constant dense<0.000000e+00> : vector<64xf32>
    %25 = vector.multi_reduction <add>, %24, %cst_11 [1] : vector<64x8xf32> to vector<64xf32>
    %26 = vector.shape_cast %25 : vector<64xf32> to vector<64x1xf32>
    %27 = vector.broadcast %26 : vector<64x1xf32> to vector<64x8xf32>
    %28 = arith.divf %24, %27 : vector<64x8xf32>
    %cst_12 = arith.constant dense<0.000000e+00> : vector<64x32xf32>
    %29 = tpu.matmul %28, %3, %cst_12 {dimension_numbers = #tpu.dot_dimension_numbers<[1], [0], [0], [1], [0, 0, 1, 1], [], []>} : vector<64x8xf32>, vector<8x32xf32>, vector<64x32xf32> -> vector<64x32xf32>
    %c0_13 = arith.constant 0 : index
    %c0_14 = arith.constant 0 : index
    %30 = vector.load %arg3[%c0_13, %c0_14] : memref<64x32xf32, #tpu.memory_space<vmem>>, vector<64x32xf32>
    tpu.vector_store %arg3[%c0_13, %c0_14], %29 {strides = array<i32>} : memref<64x32xf32, #tpu.memory_space<vmem>>, vector<64x32xf32>,
    return
  }
  func.func @transform_0(%arg0: i32) -> (i32, i32) {
    %c0_i32 = arith.constant 0 : i32
    %c0_i32_0 = arith.constant 0 : i32
    %c0_i32_1 = arith.constant 0 : i32
    return %c0_i32, %c0_i32_0 : i32, i32
  }
  func.func @transform_1(%arg0: i32) -> (i32, i32) {
    %c0_i32 = arith.constant 0 : i32
    %c0_i32_0 = arith.constant 0 : i32
    %c0_i32_1 = arith.constant 0 : i32
    return %c0_i32, %c0_i32_0 : i32, i32
  }
  func.func @transform_2(%arg0: i32) -> (i32, i32) {
    %c0_i32 = arith.constant 0 : i32
    %c0_i32_0 = arith.constant 0 : i32
    %c0_i32_1 = arith.constant 0 : i32
    return %c0_i32, %c0_i32_0 : i32, i32
  }
}

</mosaic_0001>

<bundles_post_ra>
// kernel: tpu_custom_call.1
= control target key start
LH: loop header
LB: loop body
LE: loop exit
PB: predicated region body
PF: predicated region fallthrough
CT: control target
= control target key end

     0   :  { %v747_v0 = vmov 0.0   ;;  %vm748_vm0 = vmmov 0   ;;  %vm22_vm1 = vcmask 261120   ;;  %v212_v33 = vlaneseq  ;;  %s906_s1 = inlined_call_operand.vmem [shape: f32[88,32], index: 1, kind: input, shape index: {}]   ;;  %s907_s0 = inlined_call_operand.vmem [shape: f32[64,32], index: 0, kind: input, shape index: {}]   ;;  %s908_s2 = inlined_call_operand.vmem [shape: f32[64,32], index: 2, kind: output, shape index: {}]  }
   0x1   :  { %649 = vmatprep.subr.mxu0 %v747_v0  ;;  %v19_v1 = vld [vmem:[%s906_s1 + $0x40] sm:$0xff]  ;;  %v18_v2 = vld [vmem:[%s906_s1 + $0x38] sm:$0xff]  ;;  %657 = vmatprep.mubr.msk.f32.mxu0 %vm748_vm0, %v747_v0  ;;  %v17_v3 = vld [vmem:[%s906_s1 + $0x30] sm:$0xff]  ;;  %vm364_vm3 = vcmask 64512  }
   0x2   :  { %650 = vmatpush3.msra.mxu0 %v19_v1  ;;  %660 = vmatprep.subr.mxu1 %v747_v0  ;;  %v16_v4 = vld [vmem:[%s906_s1 + $0x28] sm:$0xff]  ;;  %v21_v5 = vld [vmem:[%s906_s1 + $0x50] sm:$0xff]  ;;  %v11_v10 = vld [vmem:[%s906_s1] sm:$0xff]  ;;  %v213_v34 = vshrl.u32 %v212_v33, 7  ;;  %v354_v41 = vand.u32 127, %v212_v33 }
   0x3   :  { %651 = vmatprep.subr.mxu0 %v747_v0  ;;  %662 = vmatprep.mubr.msk.f32.mxu1 %vm748_vm0, %v747_v0  ;;  %v20_v6 = vld [vmem:[%s906_s1 + $0x48] sm:$0xff]  ;;  %v13_v12 = vld [vmem:[%s906_s1 + $0x10] sm:$0xff]  ;;  %v14_v13 = vld [vmem:[%s906_s1 + $0x18] sm:$0xff] }
   0x4   :  { %652 = vmatpush3.msra.mxu0 %v18_v2  ;;  %v12_v11 = vld [vmem:[%s906_s1 + $0x8] sm:$0xff]  ;;  %v15_v14 = vld [vmem:[%s906_s1 + $0x20] sm:$0xff]  ;;  %v206_v25 = vld [vmem:[%s907_s0 + $0x10] sm:$0xff]  ;;  %v214_v35 = vsub.s32 0, %v213_v34  ;;  %vm355_vm2 = vcmp.lt.s32.totalorder %v354_v41, 5 }
   0x5   :  { %653 = vmatprep.subr.mxu0 %v747_v0  ;;  %v204_v15 = vld [vmem:[%s907_s0] sm:$0xff]  ;;  %v205_v24 = vld [vmem:[%s907_s0 + $0x8] sm:$0xff]  ;;  %v207_v26 = vld [vmem:[%s907_s0 + $0x18] sm:$0xff] }
   0x6   :  { %654 = vmatpush3.msra.mxu0 %v17_v3  ;;  %v208_v27 = vld [vmem:[%s907_s0 + $0x20] sm:$0xff]  ;;  %v209_v28 = vld [vmem:[%s907_s0 + $0x28] sm:$0xff]  ;;  %v210_v29 = vld [vmem:[%s907_s0 + $0x30] sm:$0xff] }
   0x7   :  { %655 = vmatprep.subr.mxu0 %v747_v0  ;;  %v211_v30 = vld [vmem:[%s907_s0 + $0x38] sm:$0xff] }
   0x8   :  { %656 = vmatpush3.msra.mxu0 %v16_v4 }
   0x9   :  { %658 = vmatmul.mubr.msk.f32.vlgmr.msra.gmra.mxu0 %vm22_vm1, %v21_v5 }
   0xa   :  { %685 = vmatprep.mubr.msk.f32.mxu0 %vm22_vm1, %v204_v15 }
  0xc9   :  { %v92_v7 = vpop.f32.mrf.mxu0 }
  0xca   :  { %v93_v8 = vadd.f32 %v92_v7, %v20_v6 }
  0xcb   :  { %v659_v9 = vpop.f32.mrf.mxu0 }
  0xcc   :  { %661 = vmatpush3.xpose.msk.msra.mxu1 %vm22_vm1, %v93_v8 }
  0xcd   :  { %711 = vmatprep.subr.mxu1 %v21_v5 }
  0xcf   :  { %663 = vmatmul.mubr.msk.f32.vlgmr.msra.gmra.mxu1 %vm22_vm1, %v11_v10 }
  0xd0   :  { %665 = vmatprep.mubr.msk.f32.mxu1 %vm748_vm0, %v747_v0  ;;  %712 = vmatpush3.msra.mxu1 %v21_v5 }
  0xd3   :  { %666 = vmatmul.mubr.msk.f32.gmra.mxu1 %vm22_vm1, %v12_v11 }
  0xd4   :  { %668 = vmatprep.mubr.msk.f32.mxu1 %vm748_vm0, %v747_v0 }
  0xd7   :  { %669 = vmatmul.mubr.msk.f32.gmra.mxu1 %vm22_vm1, %v13_v12 }
  0xd8   :  { %671 = vmatprep.mubr.msk.f32.mxu1 %vm748_vm0, %v747_v0 }
  0xdb   :  { %672 = vmatmul.mubr.msk.f32.gmra.mxu1 %vm22_vm1, %v14_v13 }
  0xdc   :  { %674 = vmatprep.mubr.msk.f32.mxu1 %vm748_vm0, %v747_v0 }
  0xdf   :  { %675 = vmatmul.mubr.msk.f32.gmra.mxu1 %vm22_vm1, %v15_v14 }
 0x18f   :  { %v180_v16 = vpop.f32.mrf.mxu1 }
 0x191   :  { %v664_v17 = vpop.f32.mrf.mxu1 }
 0x193   :  { %v185_v18 = vpop.f32.mrf.mxu1 }
 0x195   :  { %v667_v19 = vpop.f32.mrf.mxu1 }
 0x197   :  { %v190_v20 = vpop.f32.mrf.mxu1 }
 0x199   :  { %v670_v21 = vpop.f32.mrf.mxu1 }
 0x19b   :  { %v195_v22 = vpop.f32.mrf.mxu1 }
 0x19c   :  { %677 = vmatprep.subr.mxu0 %v195_v22 }
 0x19d   :  { %v673_v23 = vpop.f32.mrf.mxu1  ;;  %678 = vmatpush3.msra.mxu0 %v195_v22 }
 0x19e   :  { %679 = vmatprep.subr.mxu0 %v190_v20 }
 0x19f   :  { %680 = vmatpush3.msra.mxu0 %v190_v20  ;;  %v200_v31 = vpop.f32.mrf.mxu1 }
 0x1a0   :  { %681 = vmatprep.subr.mxu0 %v185_v18  ;;  %v215_v38 = vrot.slane %v200_v31, %v214_v35 }
 0x1a1   :  { %682 = vmatpush3.msra.mxu0 %v185_v18  ;;  %v676_v32 = vpop.f32.mrf.mxu1 }
 0x1a2   :  { %683 = vmatprep.subr.mxu0 %v180_v16 }
 0x1a3   :  { %684 = vmatpush3.msra.mxu0 %v180_v16 }
 0x1a4   :  { %686 = vmatmul.mubr.msk.f32.vlgmr.msra.gmra.mxu0 %vm22_vm1, %v205_v24  ;;  %697 = vmatprep.subr.mxu0 %v21_v5 }
 0x1a5   :  { %688 = vmatprep.mubr.msk.f32.mxu0 %vm22_vm1, %v206_v25  ;;  %698 = vmatpush3.msra.mxu0 %v21_v5 }
 0x1a8   :  { %689 = vmatmul.mubr.msk.f32.gmra.mxu0 %vm22_vm1, %v207_v26 }
 0x1a9   :  { %691 = vmatprep.mubr.msk.f32.mxu0 %vm22_vm1, %v208_v27 }
 0x1ac   :  { %692 = vmatmul.mubr.msk.f32.gmra.mxu0 %vm22_vm1, %v209_v28 }
 0x1ad   :  { %694 = vmatprep.mubr.msk.f32.mxu0 %vm22_vm1, %v210_v29 }
 0x1b0   :  { %695 = vmatmul.mubr.msk.f32.gmra.mxu0 %vm22_vm1, %v211_v30 }
 0x264   :  { %v687_v36 = vpop.f32.mrf.mxu0 }
 0x265   :  { %v312_v56 = vadd.f32 %v687_v36, %v215_v38 }
 0x266   :  { %v306_v37 = vpop.f32.mrf.mxu0 }
 0x267   :  { %v307_v44 = vadd.f32 %v306_v37, %v215_v38  ;;  %v346_v2 = vmul.f32 0.17677669, %v312_v56 }
 0x268   :  { %v690_v39 = vpop.f32.mrf.mxu0 }
 0x269   :  { %v322_v40 = vadd.f32 %v690_v39, %v215_v38  ;;  %v345_v53 = vmul.f32 0.17677669, %v307_v44  ;;  %v357_v9 = vsel %vm355_vm2, %v346_v2, -1e+30 }
 0x26a   :  { %v316_v42 = vpop.f32.mrf.mxu0  ;;  %v368_v12 = vsel %vm364_vm3, %v357_v9, -inf }
 0x26b   :  { %v317_v43 = vadd.f32 %v316_v42, %v215_v38  ;;  %v348_v46 = vmul.f32 0.17677669, %v322_v40  ;;  %v356_v4 = vsel %vm355_vm2, %v345_v53, -1e+30 }
 0x26c   :  { %v693_v45 = vpop.f32.mrf.mxu0  ;;  %v365_v8 = vsel %vm364_vm3, %v356_v4, -inf }
 0x26d   :  { %v347_v47 = vmul.f32 0.17677669, %v317_v43  ;;  %v332_v48 = vadd.f32 %v693_v45, %v215_v38  ;;  %v359_v59 = vsel %vm355_vm2, %v348_v46, -1e+30 }
 0x26e   :  { %v326_v49 = vpop.f32.mrf.mxu0  ;;  %v374_v1 = vsel %vm364_vm3, %v359_v59, -inf }
 0x26f   :  { %v350_v50 = vmul.f32 0.17677669, %v332_v48  ;;  %v327_v51 = vadd.f32 %v326_v49, %v215_v38  ;;  %v358_v52 = vsel %vm355_vm2, %v347_v47, -1e+30 }
 0x270   :  { %v696_v54 = vpop.f32.mrf.mxu0  ;;  %v371_v55 = vsel %vm364_vm3, %v358_v52, -inf }
 0x271   :  { %v349_v57 = vmul.f32 0.17677669, %v327_v51  ;;  %372 = vmax.xlane.f32.xlu0 %v371_v55  ;;  %v361_v58 = vsel %vm355_vm2, %v350_v50, -1e+30  ;;  %v342_v62 = vadd.f32 %v696_v54, %v215_v38 }
 0x272   :  { %v336_v60 = vpop.f32.mrf.mxu0  ;;  %v380_v61 = vsel %vm364_vm3, %v361_v58, -inf }
 0x273   :  { %v337_v63 = vadd.f32 %v336_v60, %v215_v38  ;;  %381 = vmax.xlane.f32.xlu1 %v380_v61  ;;  %v360_v0 = vsel %vm355_vm2, %v349_v57, -1e+30  ;;  %v352_v6 = vmul.f32 0.17677669, %v342_v62 }
 0x274   :  { %v377_v5 = vsel %vm364_vm3, %v360_v0, -inf }
 0x275   :  { %v351_v3 = vmul.f32 0.17677669, %v337_v63  ;;  %375 = vmax.xlane.f32.xlu0 %v374_v1  ;;  %v363_v11 = vsel %vm355_vm2, %v352_v6, -1e+30 }
 0x276   :  { %v386_v13 = vsel %vm364_vm3, %v363_v11, -inf }
 0x277   :  { %378 = vmax.xlane.f32.xlu1 %v377_v5  ;;  %v362_v7 = vsel %vm355_vm2, %v351_v3, -1e+30 }
 0x278   :  { %v383_v10 = vsel %vm364_vm3, %v362_v7, -inf }
 0x279   :  { %366 = vmax.xlane.f32.xlu0 %v365_v8 }
 0x27b   :  { %384 = vmax.xlane.f32.xlu1 %v383_v10 }
 0x27d   :  { %369 = vmax.xlane.f32.xlu0 %v368_v12 }
 0x27f   :  { %387 = vmax.xlane.f32.xlu1 %v386_v13 }
 0x2fa   :  { %v373_v14 = vpop.xlane.xlu0 %372 }
 0x2fb   :  { %v391_v15 = vsub.f32 %v358_v52, %v373_v14 }
 0x2fc   :  { %v382_v16 = vpop.xlane.xlu1 %381 }
 0x2fd   :  { %v401_v17 = vmul.f32 1.442695, %v391_v15  ;;  %v394_v18 = vsub.f32 %v361_v58, %v382_v16 }
 0x2fe   :  { %v376_v19 = vpop.xlane.xlu0 %375 }
 0x2ff   :  { %715 = vpow2.f32 %v401_v17  ;;  %v392_v20 = vsub.f32 %v359_v59, %v376_v19  ;;  %v407_v21 = vmul.f32 1.442695, %v394_v18 }
 0x300   :  { %v379_v22 = vpop.xlane.xlu1 %378 }
 0x301   :  { %v403_v23 = vmul.f32 1.442695, %v392_v20  ;;  %v393_v24 = vsub.f32 %v360_v0, %v379_v22 }
 0x302   :  { %v367_v25 = vpop.xlane.xlu0 %366 }
 0x303   :  { %717 = vpow2.f32 %v403_v23  ;;  %v405_v26 = vmul.f32 1.442695, %v393_v24  ;;  %v389_v27 = vsub.f32 %v356_v4, %v367_v25 }
 0x304   :  { %719 = vpow2.f32 %v407_v21  ;;  %v385_v28 = vpop.xlane.xlu1 %384 }
 0x305   :  { %721 = vpow2.f32 %v405_v26  ;;  %v397_v29 = vmul.f32 1.442695, %v389_v27  ;;  %v395_v30 = vsub.f32 %v362_v7, %v385_v28 }
 0x306   :  { %v370_v31 = vpop.xlane.xlu0 %369 }
 0x307   :  { %723 = vpow2.f32 %v397_v29  ;;  %v409_v32 = vmul.f32 1.442695, %v395_v30  ;;  %v390_v33 = vsub.f32 %v357_v9, %v370_v31 }
 0x308   :  { %v388_v34 = vpop.xlane.xlu1 %387 }
 0x309   :  { %725 = vpow2.f32 %v409_v32  ;;  %v399_v35 = vmul.f32 1.442695, %v390_v33  ;;  %v396_v36 = vsub.f32 %v363_v11, %v388_v34 }
 0x30b   :  { %727 = vpow2.f32 %v399_v35  ;;  %v411_v37 = vmul.f32 1.442695, %v396_v36 }
 0x30c   :  { %v716_v38 = vpop.eup %715 }
 0x30d   :  { %729 = vpow2.f32 %v411_v37  ;;  %v419_v39 = vsel %vm364_vm3, %v716_v38, 0.0 }
 0x30e   :  { %420 = vadd.xlane.f32.xlu0 %v419_v39 }
 0x310   :  { %v718_v40 = vpop.eup %717 }
 0x311   :  { %v720_v41 = vpop.eup %719  ;;  %v422_v42 = vsel %vm364_vm3, %v718_v40, 0.0 }
 0x312   :  { %v722_v43 = vpop.eup %721  ;;  %423 = vadd.xlane.f32.xlu1 %v422_v42  ;;  %v428_v46 = vsel %vm364_vm3, %v720_v41, 0.0 }
 0x313   :  { %v425_v44 = vsel %vm364_vm3, %v722_v43, 0.0 }
 0x314   :  { %v724_v45 = vpop.eup %723  ;;  %426 = vadd.xlane.f32.xlu0 %v425_v44 }
 0x315   :  { %v413_v48 = vsel %vm364_vm3, %v724_v45, 0.0 }
 0x316   :  { %v726_v47 = vpop.eup %725  ;;  %429 = vadd.xlane.f32.xlu1 %v428_v46 }
 0x317   :  { %v431_v50 = vsel %vm364_vm3, %v726_v47, 0.0 }
 0x318   :  { %v728_v49 = vpop.eup %727  ;;  %414 = vadd.xlane.f32.xlu0 %v413_v48 }
 0x319   :  { %v416_v52 = vsel %vm364_vm3, %v728_v49, 0.0 }
 0x31a   :  { %v730_v51 = vpop.eup %729  ;;  %432 = vadd.xlane.f32.xlu1 %v431_v50 }
 0x31b   :  { %v434_v53 = vsel %vm364_vm3, %v730_v51, 0.0 }
 0x31c   :  { %417 = vadd.xlane.f32.xlu0 %v416_v52 }
 0x31e   :  { %435 = vadd.xlane.f32.xlu1 %v434_v53 }
 0x397   :  { %v421_v54 = vpop.xlane.xlu0 %420 }
 0x398   :  { %731 = vrcp.f32 %v421_v54 }
 0x39b   :  { %v424_v55 = vpop.xlane.xlu1 %423 }
 0x39c   :  { %733 = vrcp.f32 %v424_v55 }
 0x39d   :  { %v427_v56 = vpop.xlane.xlu0 %426 }
 0x39e   :  { %735 = vrcp.f32 %v427_v56 }
 0x39f   :  { %v430_v57 = vpop.xlane.xlu1 %429 }
 0x3a0   :  { %737 = vrcp.f32 %v430_v57 }
 0x3a1   :  { %v415_v58 = vpop.xlane.xlu0 %414 }
 0x3a2   :  { %739 = vrcp.f32 %v415_v58 }
 0x3a3   :  { %v433_v59 = vpop.xlane.xlu1 %432 }
 0x3a4   :  { %741 = vrcp.f32 %v433_v59 }
 0x3a5   :  { %v732_v60 = vpop.eup %731  ;;  %v418_v61 = vpop.xlane.xlu0 %417 }
 0x3a6   :  { %743 = vrcp.f32 %v418_v61  ;;  %v442_v62 = vmul.f32 %v732_v60, %v716_v38 }
 0x3a7   :  { %v436_v63 = vpop.xlane.xlu1 %435 }
 0x3a8   :  { %745 = vrcp.f32 %v436_v63  ;;  %702 = vmatprep.mubr.msk.f32.mxu1 %vm364_vm3, %v442_v62 }
 0x3a9   :  { %v734_v0 = vpop.eup %733 }
 0x3aa   :  { %v444_v1 = vmul.f32 %v734_v0, %v718_v40 }
 0x3ab   :  { %v736_v2 = vpop.eup %735 }
 0x3ac   :  { %703 = vmatmul.mubr.msk.f32.vlgmr.msra.gmra.mxu1 %vm364_vm3, %v444_v1  ;;  %v446_v3 = vmul.f32 %v736_v2, %v722_v43 }
 0x3ad   :  { %v738_v4 = vpop.eup %737 }
 0x3ae   :  { %705 = vmatprep.mubr.msk.f32.mxu1 %vm364_vm3, %v446_v3  ;;  %v448_v5 = vmul.f32 %v738_v4, %v720_v41 }
 0x3af   :  { %v740_v6 = vpop.eup %739 }
 0x3b0   :  { %706 = vmatmul.mubr.msk.f32.gmra.mxu1 %vm364_vm3, %v448_v5  ;;  %v438_v7 = vmul.f32 %v740_v6, %v724_v45 }
 0x3b1   :  { %v742_v8 = vpop.eup %741 }
 0x3b2   :  { %699 = vmatprep.mubr.msk.f32.mxu0 %vm364_vm3, %v438_v7  ;;  %v450_v9 = vmul.f32 %v742_v8, %v726_v47 }
 0x3b3   :  { %v744_v10 = vpop.eup %743 }
 0x3b4   :  { %v440_v11 = vmul.f32 %v744_v10, %v728_v49  ;;  %708 = vmatprep.mubr.msk.f32.mxu1 %vm364_vm3, %v450_v9 }
 0x3b5   :  { %v746_v12 = vpop.eup %745 }
 0x3b6   :  { %700 = vmatmul.mubr.msk.f32.vlgmr.msra.gmra.mxu0 %vm364_vm3, %v440_v11  ;;  %v452_v13 = vmul.f32 %v746_v12, %v730_v51 }
 0x3b8   :  { %709 = vmatmul.mubr.msk.f32.gmra.mxu1 %vm364_vm3, %v452_v13 }
 0x46c   :  { %v704_v14 = vpop.f32.mrf.mxu1 }
 0x46d   :  { %585 = vst.msk [vmem:[%s908_s2 + $0x18] sm:$0xff] %vm22_vm1, %v704_v14 }
 0x46e   :  { %v553_v15 = vpop.f32.mrf.mxu1 }
 0x46f   :  { %584 = vst.msk [vmem:[%s908_s2 + $0x10] sm:$0xff] %vm22_vm1, %v553_v15 }
 0x470   :  { %v707_v16 = vpop.f32.mrf.mxu1 }
 0x471   :  { %587 = vst.msk [vmem:[%s908_s2 + $0x28] sm:$0xff] %vm22_vm1, %v707_v16 }
 0x472   :  { %v563_v17 = vpop.f32.mrf.mxu1 }
 0x473   :  { %586 = vst.msk [vmem:[%s908_s2 + $0x20] sm:$0xff] %vm22_vm1, %v563_v17 }
 0x476   :  { %v701_v18 = vpop.f32.mrf.mxu0 }
 0x477   :  { %583 = vst.msk [vmem:[%s908_s2 + $0x8] sm:$0xff] %vm22_vm1, %v701_v18 }
 0x478   :  { %v543_v19 = vpop.f32.mrf.mxu0  ;;  %v710_v20 = vpop.f32.mrf.mxu1 }
 0x479   :  { %582 = vst.msk [vmem:[%s908_s2] sm:$0xff] %vm22_vm1, %v543_v19  ;;  %589 = vst.msk [vmem:[%s908_s2 + $0x38] sm:$0xff] %vm22_vm1, %v710_v20 }
 0x47a   :  { %v573_v21 = vpop.f32.mrf.mxu1 }
 0x47b   :  { %588 = vst.msk [vmem:[%s908_s2 + $0x30] sm:$0xff] %vm22_vm1, %v573_v21 }

</bundles_post_ra>
